<compile_context>
chip_gen: v7x
topology: tpu7x:2x2x1
jax: 0.10.0
libtpu: 0.0.40
codegen_flags: <defaults>
</compile_context>

<pallas_src>
import math

import jax
import jax.numpy as jnp
from jax import lax
from jax.experimental import pallas as pl
from jax.experimental.pallas import tpu as pltpu

_EPS = 1e-12                       # torch.nn.functional.normalize default eps
_EPS_SQ = _EPS * _EPS              # clamp on the squared norm (f32-representable)
_TILE_F32_BYTES = 2 * 1024 * 1024  # per-tile f32 working-set target (~85% HBM roofline)
_VMEM_LIMIT_BYTES = 48 * 1024 * 1024  # > default scoped limit on v5e/v6e/v7x, < v7x physical


def _rmsnorm_rows_kernel(x_ref, s_ref, o_ref):
    # x_ref: (tb, D) tile, s_ref: (1, D) = g*sqrt(D), o_ref: (tb, D).
    xf = x_ref[...].astype(jnp.float32)
    ssum = jnp.sum(xf * xf, axis=-1, keepdims=True)           # (tb, 1) lane reduce (XLU)
    inv = lax.rsqrt(jnp.maximum(ssum, jnp.float32(_EPS_SQ)))  # EUP; == 1/max(||x||, eps)
    o_ref[...] = (xf * inv * s_ref[...]).astype(o_ref.dtype)


def _rmsnorm_cols_kernel(x_ref, s_ref, o_ref):
    # Lane-dense path for small D: x_ref (D, tb), s_ref (D, 1), o_ref (D, tb).
    # Normalizes each column; reduction is over sublanes, stores are full-lane.
    xf = x_ref[...].astype(jnp.float32)
    ssum = jnp.sum(xf * xf, axis=0, keepdims=True)            # (1, tb)
    inv = lax.rsqrt(jnp.maximum(ssum, jnp.float32(_EPS_SQ)))
    o_ref[...] = (xf * inv * s_ref[...]).astype(o_ref.dtype)


def _pick_tile(total, multiple, budget_elems):
    """Largest tile along an axis that is a multiple of `multiple` (or the full
    axis), within budget_elems, preferring exact divisors of `total`."""
    budget = max(multiple, (budget_elems // multiple) * multiple)
    if total <= budget:
        return total  # full extent (always legal for BlockSpec)
    t = budget
    while t >= multiple:
        if total % t == 0:
            return t
        t -= multiple
    return budget  # no nice divisor: cdiv grid + masked boundary block


def rmsnorm_mlp(x, g, *, block_batch=None):
    """x: (B, D), g: (1, D) -> F.normalize(x, dim=1) * g * sqrt(D)."""
    B, D = x.shape
    assert g.shape == (1, D)

    # Hoist the gain prep: do g * sqrt(D) once, outside the grid loop.
    scale = g.astype(jnp.float32) * jnp.float32(math.sqrt(D))

    itemsize = jnp.dtype(x.dtype).itemsize
    sublane = 16 if itemsize == 2 else 8

    compiler_params = pltpu.CompilerParams(
        dimension_semantics=("parallel",),
        vmem_limit_bytes=_VMEM_LIMIT_BYTES,
    )

    if D >= 128:
        # dim-last layout: reduction over lanes, batch tiled across the grid.
        budget_rows = _TILE_F32_BYTES // (D * 4)
        tb = block_batch if block_batch is not None else _pick_tile(B, sublane, budget_rows)
        assert tb == B or tb % sublane == 0, (
            "block_batch must be a multiple of 8 (f32) / 16 (bf16) or equal the batch")
        grid = (pl.cdiv(B, tb),)
        return pl.pallas_call(
            _rmsnorm_rows_kernel,
            out_shape=jax.ShapeDtypeStruct((B, D), x.dtype),
            grid_spec=pltpu.PrefetchScalarGridSpec(
                num_scalar_prefetch=0,
                grid=grid,
                in_specs=[
                    pl.BlockSpec((tb, D), lambda i: (i, 0)),   # x tile
                    pl.BlockSpec((1, D), lambda i: (0, 0)),    # hoisted scale (resident)
                ],
                out_specs=pl.BlockSpec((tb, D), lambda i: (i, 0)),
            ),
            compiler_params=compiler_params,
        )(x, scale)

    # Small D (< 128): transpose so the large batch axis maps to lanes.
    x_t = x.T                # (D, B)
    scale_t = scale.T        # (D, 1)
    budget_cols = _TILE_F32_BYTES // (D * 4)
    tb = block_batch if block_batch is not None else _pick_tile(B, 128, budget_cols)
    assert tb == B or tb % 128 == 0, (
        "block_batch must be a multiple of 128 or equal the batch on the small-D path")
    grid = (pl.cdiv(B, tb),)
    out_t = pl.pallas_call(
        _rmsnorm_cols_kernel,
        out_shape=jax.ShapeDtypeStruct((D, B), x.dtype),
        grid_spec=pltpu.PrefetchScalarGridSpec(
            num_scalar_prefetch=0,
            grid=grid,
            in_specs=[
                pl.BlockSpec((D, tb), lambda i: (0, i)),       # x^T tile (lane-dense)
                pl.BlockSpec((D, 1), lambda i: (0, 0)),        # scale^T (resident)
            ],
            out_specs=pl.BlockSpec((D, tb), lambda i: (0, i)),
        ),
        compiler_params=compiler_params,
    )(x_t, scale_t)
    return out_t.T


def _reference(x, g):
    xf = x.astype(jnp.float32)
    norm = jnp.maximum(jnp.sqrt(jnp.sum(xf * xf, axis=1, keepdims=True)), _EPS)
    return ((xf / norm) * g.astype(jnp.float32) * math.sqrt(x.shape[1])).astype(x.dtype)


if __name__ == "__main__":
    key = jax.random.PRNGKey(0)
    k1, k2 = jax.random.split(key)

    # Small-D case (matches the module's real usage, e.g. dim=32): lane-dense path.
    B1, D1 = 8, 32
    x1 = jax.random.normal(k1, (B1, D1), dtype=jnp.float32)
    g1 = jnp.ones((1, D1), dtype=jnp.float32)            # nn.Parameter(torch.ones(1, dim))
    out1 = jax.block_until_ready(rmsnorm_mlp(x1, g1))
    ref1 = _reference(x1, g1)
    assert out1.shape == (B1, D1)
    assert jnp.allclose(out1, ref1, atol=1e-5, rtol=1e-5), "small-D path mismatch"

    # Wide-D case: batch-tiled, multi-step pipelined grid (row path).
    B2, D2 = 64, 256
    x2 = jax.random.normal(k2, (B2, D2), dtype=jnp.float32)
    g2 = jax.random.normal(jax.random.PRNGKey(1), (1, D2), dtype=jnp.float32)
    out2 = jax.block_until_ready(rmsnorm_mlp(x2, g2, block_batch=16))
    ref2 = _reference(x2, g2)
    assert out2.shape == (B2, D2)
    assert jnp.allclose(out2, ref2, atol=1e-5, rtol=1e-5), "row path mismatch"

    print("KERNEL_OK")
</pallas_src>

<mosaic_0001>
module attributes {stable_mosaic.version = 11 : i64} {
  func.func @_rmsnorm_cols_kernel(%arg0: i32, %arg1: memref<32x8xf32, #tpu.memory_space<vmem>>, %arg2: memref<32x1xf32, #tpu.memory_space<vmem>>, %arg3: memref<32x8xf32, #tpu.memory_space<vmem>>) attributes {dimension_semantics = [#tpu.dimension_semantics<parallel>], iteration_bounds = array<i64: 1>, scalar_prefetch = 0 : i64, scratch_operands = 0 : i64, tpu.core_type = #tpu.core_type<tc>, window_params = [{transform_indices = @transform_0, window_bounds = array<i64: 32, 8>}, {pipeline_mode = #tpu.pipeline_mode<synchronous>, transform_indices = @transform_1, window_bounds = array<i64: 32, 1>}, {transform_indices = @transform_2, window_bounds = array<i64: 32, 8>}]} {
    %c0 = arith.constant 0 : index
    %c0_0 = arith.constant 0 : index
    %0 = vector.load %arg1[%c0, %c0_0] : memref<32x8xf32, #tpu.memory_space<vmem>>, vector<32x8xf32>
    %1 = arith.mulf %0, %0 : vector<32x8xf32>
    %cst = arith.constant dense<0.000000e+00> : vector<8xf32>
    %2 = vector.multi_reduction <add>, %1, %cst [0] : vector<32x8xf32> to vector<8xf32>
    %3 = vector.shape_cast %2 : vector<8xf32> to vector<1x8xf32>
    %cst_1 = arith.constant 1.000000e-24 : f32
    %4 = vector.broadcast %cst_1 : f32 to vector<1x8xf32>
    %5 = arith.maximumf %3, %4 : vector<1x8xf32>
    %6 = math.rsqrt %5 : vector<1x8xf32>
    %7 = vector.broadcast %6 : vector<1x8xf32> to vector<32x8xf32>
    %8 = arith.mulf %0, %7 : vector<32x8xf32>
    %c0_2 = arith.constant 0 : index
    %c0_3 = arith.constant 0 : index
    %9 = vector.load %arg2[%c0_2, %c0_3] : memref<32x1xf32, #tpu.memory_space<vmem>>, vector<32x1xf32>
    %10 = vector.broadcast %9 : vector<32x1xf32> to vector<32x8xf32>
    %11 = arith.mulf %8, %10 : vector<32x8xf32>
    %c0_4 = arith.constant 0 : index
    %c0_5 = arith.constant 0 : index
    %12 = vector.load %arg3[%c0_4, %c0_5] : memref<32x8xf32, #tpu.memory_space<vmem>>, vector<32x8xf32>
    tpu.vector_store %arg3[%c0_4, %c0_5], %11 {strides = array<i32>} : memref<32x8xf32, #tpu.memory_space<vmem>>, vector<32x8xf32>,
    return
  }
  func.func @transform_0(%arg0: i32) -> (i32, i32) {
    %c0_i32 = arith.constant 0 : i32
    %c0_i32_0 = arith.constant 0 : i32
    return %c0_i32, %arg0 : i32, i32
  }
  func.func @transform_1(%arg0: i32) -> (i32, i32) {
    %c0_i32 = arith.constant 0 : i32
    %c0_i32_0 = arith.constant 0 : i32
    %c0_i32_1 = arith.constant 0 : i32
    return %c0_i32, %c0_i32_0 : i32, i32
  }
  func.func @transform_2(%arg0: i32) -> (i32, i32) {
    %c0_i32 = arith.constant 0 : i32
    %c0_i32_0 = arith.constant 0 : i32
    return %c0_i32, %arg0 : i32, i32
  }
}

</mosaic_0001>

<bundles_post_ra>
// kernel: tpu_custom_call.1
= control target key start
LH: loop header
LB: loop body
LE: loop exit
PB: predicated region body
PF: predicated region fallthrough
CT: control target
= control target key end

     0   :  { %v80_v0 = vmov 0   ;;  %vm19_vm0 = vcmask 64512   ;;  %s140_s1 = inlined_call_operand.vmem [shape: f32[32,1], index: 1, kind: input, shape index: {}]   ;;  %s141_s0 = inlined_call_operand.vmem [shape: f32[32,8], index: 0, kind: input, shape index: {}]   ;;  %s142_s2 = inlined_call_operand.vmem [shape: f32[32,8], index: 2, kind: output, shape index: {}]  }
   0x1   :  { %77 = vset.pattern.permute.xlu1 %v80_v0  ;;  %76 = vset.pattern.permute.xlu0 %v80_v0  ;;  %v41_v1 = vld [vmem:[%s140_s1 + $0x10] sm:$0xff]  ;;  %v39_v2 = vld [vmem:[%s140_s1] sm:$0xff]  ;;  %v42_v3 = vld [vmem:[%s140_s1 + $0x18] sm:$0xff] }
   0x2   :  { %55 = vperm.xlu1 %77, %v41_v1   ;;  %45 = vperm.xlu0 %76, %v39_v2   ;;  %v40_v4 = vld [vmem:[%s140_s1 + $0x8] sm:$0xff]  ;;  %v11_v5 = vld [vmem:[%s141_s0] sm:$0xff]  ;;  %v13_v9 = vld [vmem:[%s141_s0 + $0x10] sm:$0xff] }
   0x3   :  { %v12_v6 = vld [vmem:[%s141_s0 + $0x8] sm:$0xff]  ;;  %v15_v7 = vmul.f32 %v11_v5, %v11_v5  ;;  %v17_v10 = vmul.f32 %v13_v9, %v13_v9  ;;  %v14_v13 = vld [vmem:[%s141_s0 + $0x18] sm:$0xff] }
   0x4   :  { %v16_v8 = vmul.f32 %v12_v6, %v12_v6  ;;  %v18_v15 = vmul.f32 %v14_v13, %v14_v13 }
   0x5   :  { %v20_v11 = vsel %vm19_vm0, %v15_v7, 0.0  ;;  %v23_v16 = vsel %vm19_vm0, %v17_v10, 0.0 }
   0x6   :  { %60 = vperm.xlu1 %77, %v42_v3   ;;  %50 = vperm.xlu0 %76, %v40_v4   ;;  %v21_v12 = vsel %vm19_vm0, %v16_v8, 0.0  ;;  %v25_v18 = vsel %vm19_vm0, %v18_v15, 0.0 }
   0x7   :  { %v22_v14 = vadd.f32 %v21_v12, %v20_v11 }
   0x9   :  { %v24_v17 = vadd.f32 %v23_v16, %v22_v14 }
   0xb   :  { %v26_v19 = vadd.f32 %v25_v18, %v24_v17 }
   0xd   :  { %v27_v20 = vrot.slane %v26_v19, 4 }
   0xf   :  { %v28_v21 = vadd.f32 %v27_v20, %v26_v19 }
  0x11   :  { %v29_v22 = vrot.slane %v28_v21, 2 }
  0x13   :  { %v30_v23 = vadd.f32 %v29_v22, %v28_v21 }
  0x15   :  { %v31_v24 = vrot.slane %v30_v23, 1 }
  0x17   :  { %v32_v25 = vadd.f32 %v31_v24, %v30_v23 }
  0x19   :  { %v33_v26 = vmax.f32 %v32_v25, 1e-24 }
  0x1b   :  { %78 = vrsqrt.f32 %v33_v26 }
  0x25   :  { %v79_v27 = vpop.eup %78 }
  0x26   :  { %v37_v28 = vmul.f32 %v79_v27, %v13_v9  ;;  %v35_v29 = vmul.f32 %v79_v27, %v11_v5  ;;  %v38_v34 = vmul.f32 %v79_v27, %v14_v13  ;;  %v36_v35 = vmul.f32 %v79_v27, %v12_v6 }
  0x81   :  { %v56_v30 = vpop.permute.xlu1 %55  ;;  %v46_v31 = vpop.permute.xlu0 %45 }
  0x82   :  { %v65_v32 = vmul.f32 %v56_v30, %v37_v28  ;;  %v63_v33 = vmul.f32 %v46_v31, %v35_v29 }
  0x84   :  { %69 = vst.msk [vmem:[%s142_s2 + $0x10] sm:$0xff] %vm19_vm0, %v65_v32  ;;  %67 = vst.msk [vmem:[%s142_s2] sm:$0xff] %vm19_vm0, %v63_v33 }
  0x85   :  { %v61_v36 = vpop.permute.xlu1 %60  ;;  %v51_v37 = vpop.permute.xlu0 %50 }
  0x86   :  { %v66_v38 = vmul.f32 %v61_v36, %v38_v34  ;;  %v64_v39 = vmul.f32 %v51_v37, %v36_v35 }
  0x88   :  { %70 = vst.msk [vmem:[%s142_s2 + $0x18] sm:$0xff] %vm19_vm0, %v66_v38  ;;  %68 = vst.msk [vmem:[%s142_s2 + $0x8] sm:$0xff] %vm19_vm0, %v64_v39 }

</bundles_post_ra>
